<compile_context>
chip_gen: v5e
topology: v5e:2x2
jax: 0.10.0
libtpu: 0.0.40
codegen_flags: <defaults>
</compile_context>

<pallas_src>
import functools

import jax
import jax.numpy as jnp
from jax import lax
from jax.experimental import pallas as pl
from jax.experimental.pallas import tpu as pltpu

EPS = 1e-5                              # nn.InstanceNorm2d default eps
_FUSED_VMEM_BUDGET = 16 * 1024 * 1024   # double-buffered working set allowed for the fused path
_TILE_VMEM_BUDGET = 12 * 1024 * 1024    # double-buffered working set per P tile (two-sweep path)
_VMEM_LIMIT = 40 * 1024 * 1024          # safe on v5e/v6e (128 MiB) and v7x (64 MiB) alike


# ---------------------------------------------------------------------------
# Kernels
# ---------------------------------------------------------------------------
def _fused_kernel(w_ref, x_ref, o_ref):
    """One image: conv GEMM + fused InstanceNorm + ReLU.

    w_ref: (Co, 9C)  bf16   flattened conv weight
    x_ref: (9C, P)   bf16   im2col slab for this image
    o_ref: (Co, P)   f32    normalized, ReLU'd output (reshaped to NCHW outside)
    """
    acc = jnp.dot(w_ref[...], x_ref[...], preferred_element_type=jnp.float32)   # (Co, P)
    inv_p = 1.0 / acc.shape[-1]
    mean = jnp.sum(acc, axis=-1, keepdims=True) * inv_p                          # (Co, 1)
    centered = acc - mean
    var = jnp.sum(centered * centered, axis=-1, keepdims=True) * inv_p           # (Co, 1)
    y = centered * lax.rsqrt(var + EPS)
    o_ref[...] = jnp.maximum(y, 0.0).astype(o_ref.dtype)


def _conv_stats_kernel(w_ref, x_ref, y_ref, s_ref, ss_ref):
    """P-tiled sweep 1: conv GEMM for one (image, P-tile) + per-image sum / sumsq accumulation.

    w_ref:  (Co, 9C)  bf16
    x_ref:  (9C, Pt)  bf16
    y_ref:  (Co, Pt)  f32   raw conv output tile
    s_ref:  (Co, 1)   f32   per-image channel sums   (resident across the p axis)
    ss_ref: (Co, 1)   f32   per-image channel sumsqs (resident across the p axis)
    """
    p = pl.program_id(1)

    @pl.when(p == 0)
    def _():
        s_ref[...] = jnp.zeros_like(s_ref)
        ss_ref[...] = jnp.zeros_like(ss_ref)

    acc = jnp.dot(w_ref[...], x_ref[...], preferred_element_type=jnp.float32)
    y_ref[...] = acc.astype(y_ref.dtype)
    s_ref[...] += jnp.sum(acc, axis=-1, keepdims=True)
    ss_ref[...] += jnp.sum(acc * acc, axis=-1, keepdims=True)


def _norm_relu_kernel(y_ref, s_ref, ss_ref, o_ref, *, inv_p):
    """P-tiled sweep 2: InstanceNorm (from precomputed sum/sumsq) + ReLU, fully elementwise."""
    mean = s_ref[...] * inv_p                       # (Co, 1)
    var = ss_ref[...] * inv_p - mean * mean
    scale = lax.rsqrt(var + EPS)
    o_ref[...] = jnp.maximum((y_ref[...] - mean) * scale, 0.0).astype(o_ref.dtype)


# ---------------------------------------------------------------------------
# Wrapper
# ---------------------------------------------------------------------------
def _tile_bytes(k, co, pt):
    # double-buffered input slab + double-buffered f32 output tile + weight + stats
    return 2 * (k * pt * 2) + 2 * (co * pt * 4) + 2 * (co * k * 2) + 4 * (co * 4)


def _choose_p_tile(p_total, k, co):
    """Largest 128-multiple tile dividing P whose double-buffered working set fits the budget."""
    if p_total % 128 != 0:
        return p_total           # full-extent block (valid: equals the array dim); tiny inputs only
    best = 128
    t = 256
    while t < p_total:
        if p_total % t == 0 and _tile_bytes(k, co, t) <= _TILE_VMEM_BUDGET:
            best = t
        t += 128
    return best


def encoder_block(x, w, b=None, *, p_tile=None):
    """Forward pass of EncoderBlock(use_bn=True, activation='relu').

    x: (N, C, H, W)      float32, NCHW
    w: (2C, C, 3, 3)     Conv2d weight (out_ch, in_ch, kH, kW)
    b: (2C,) or None     Conv2d bias -- accepted but unused: it is cancelled exactly by the
                         InstanceNorm mean subtraction, so feeding it to the kernel is dead work.
    returns (N, 2C, H//2, W//2) float32
    """
    del b  # cancelled by InstanceNorm2d(affine=False)

    N, C, H, W = x.shape
    Co = 2 * C
    OH = (H - 1) // 2 + 1
    OW = (W - 1) // 2 + 1
    P = OH * OW
    K = 9 * C

    # --- glue: reflect pad + stride-2 im2col, kept NCHW end-to-end, built in bf16 ---
    xb = x.astype(jnp.bfloat16)
    x_pad = jnp.pad(xb, ((0, 0), (0, 0), (1, 1), (1, 1)), mode="reflect")     # (N, C, H+2, W+2)
    taps = []
    for kh in range(3):
        for kw in range(3):
            t = x_pad[:, :, kh:kh + 2 * OH - 1:2, kw:kw + 2 * OW - 1:2]       # (N, C, OH, OW)
            taps.append(t.reshape(N, C, P))
    x_col = jnp.concatenate(taps, axis=1)                                      # (N, 9C, P) bf16

    # weight flattened to (Co, 9C); column order (kh, kw, c) matches x_col's row order
    w_col = jnp.transpose(w, (0, 2, 3, 1)).reshape(Co, K).astype(jnp.bfloat16)

    # --- path selection: fused single pass vs P-tiled two-sweep ---
    fused_bytes = 2 * (K * P * 2) + 2 * (Co * P * 4) + 2 * (Co * K * 2)        # double-buffered est.
    use_fused = (p_tile is None) and (fused_bytes <= _FUSED_VMEM_BUDGET)

    if use_fused:
        out = pl.pallas_call(
            _fused_kernel,
            out_shape=jax.ShapeDtypeStruct((N, Co, P), jnp.float32),
            grid_spec=pltpu.PrefetchScalarGridSpec(
                num_scalar_prefetch=0,
                grid=(N,),
                in_specs=[
                    pl.BlockSpec((Co, K), lambda n: (0, 0)),            # shared weight (resident)
                    pl.BlockSpec((None, K, P), lambda n: (n, 0, 0)),    # one image's im2col slab
                ],
                out_specs=pl.BlockSpec((None, Co, P), lambda n: (n, 0, 0)),
            ),
            compiler_params=pltpu.CompilerParams(
                dimension_semantics=("parallel",),
                vmem_limit_bytes=_VMEM_LIMIT,
            ),
        )(w_col, x_col)
        return out.reshape(N, Co, OH, OW)

    # ---- P-tiled two-sweep path ----
    Pt = p_tile if p_tile is not None else _choose_p_tile(P, K, Co)
    assert P % Pt == 0 and (Pt == P or Pt % 128 == 0), (P, Pt)
    PT = P // Pt

    # Sweep 1: conv GEMM per (image, P tile) + per-image sum/sumsq resident accumulators.
    # (Intermediate kept f32 for accuracy; bf16 would halve this HBM roundtrip if tolerable.)
    conv, ssum, ssq = pl.pallas_call(
        _conv_stats_kernel,
        out_shape=(
            jax.ShapeDtypeStruct((N, Co, P), jnp.float32),
            jax.ShapeDtypeStruct((N, Co, 1), jnp.float32),
            jax.ShapeDtypeStruct((N, Co, 1), jnp.float32),
        ),
        grid_spec=pltpu.PrefetchScalarGridSpec(
            num_scalar_prefetch=0,
            grid=(N, PT),
            in_specs=[
                pl.BlockSpec((Co, K), lambda n, p: (0, 0)),
                pl.BlockSpec((None, K, Pt), lambda n, p: (n, 0, p)),
            ],
            out_specs=(
                pl.BlockSpec((None, Co, Pt), lambda n, p: (n, 0, p)),
                pl.BlockSpec((None, Co, 1), lambda n, p: (n, 0, 0)),    # resident accumulator
                pl.BlockSpec((None, Co, 1), lambda n, p: (n, 0, 0)),    # resident accumulator
            ),
        ),
        compiler_params=pltpu.CompilerParams(
            dimension_semantics=("parallel", "arbitrary"),
            vmem_limit_bytes=_VMEM_LIMIT,
        ),
    )(w_col, x_col)

    # Sweep 2: normalize + ReLU, fully parallel over (image, P tile).
    out = pl.pallas_call(
        functools.partial(_norm_relu_kernel, inv_p=1.0 / P),
        out_shape=jax.ShapeDtypeStruct((N, Co, P), jnp.float32),
        grid_spec=pltpu.PrefetchScalarGridSpec(
            num_scalar_prefetch=0,
            grid=(N, PT),
            in_specs=[
                pl.BlockSpec((None, Co, Pt), lambda n, p: (n, 0, p)),
                pl.BlockSpec((None, Co, 1), lambda n, p: (n, 0, 0)),
                pl.BlockSpec((None, Co, 1), lambda n, p: (n, 0, 0)),
            ],
            out_specs=pl.BlockSpec((None, Co, Pt), lambda n, p: (n, 0, p)),
        ),
        compiler_params=pltpu.CompilerParams(
            dimension_semantics=("parallel", "parallel"),
            vmem_limit_bytes=_VMEM_LIMIT,
        ),
    )(conv, ssum, ssq)
    return out.reshape(N, Co, OH, OW)


# ---------------------------------------------------------------------------
# Pure-JAX reference (independent XLA path, f32, includes the conv bias)
# ---------------------------------------------------------------------------
def encoder_block_ref(x, w, b):
    x_pad = jnp.pad(x, ((0, 0), (0, 0), (1, 1), (1, 1)), mode="reflect")
    y = lax.conv_general_dilated(
        x_pad, w, window_strides=(2, 2), padding="VALID",
        dimension_numbers=("NCHW", "OIHW", "NCHW"),
        precision=lax.Precision.HIGHEST)
    y = y + b[None, :, None, None]
    mean = jnp.mean(y, axis=(2, 3), keepdims=True)
    var = jnp.mean((y - mean) ** 2, axis=(2, 3), keepdims=True)
    y = (y - mean) * lax.rsqrt(var + EPS)
    return jnp.maximum(y, 0.0)


if __name__ == "__main__":
    key = jax.random.PRNGKey(0)
    k1, k2, k3 = jax.random.split(key, 3)

    N, C, H, W = 2, 4, 16, 16
    Co = 2 * C
    x = jax.random.normal(k1, (N, C, H, W), jnp.float32)
    w = jax.random.normal(k2, (Co, C, 3, 3), jnp.float32) * 0.1
    b = jax.random.normal(k3, (Co,), jnp.float32) * 0.1

    # Tolerance reflects bf16 MXU operands (f32 accumulation): ~1e-2 worst-case after norm.
    ATOL = RTOL = 3e-2

    # Path 1: fused single-pass kernel (whole image per grid step).
    out = jax.block_until_ready(encoder_block(x, w, b))
    ref = jax.block_until_ready(encoder_block_ref(x, w, b))
    assert out.shape == (N, Co, H // 2, W // 2), out.shape
    assert jnp.allclose(out, ref, atol=ATOL, rtol=RTOL), float(jnp.max(jnp.abs(out - ref)))

    # Path 2: P-tiled two-sweep path (spatial tiling + fused sum/sumsq accumulators).
    H2 = W2 = 32
    x2 = jax.random.normal(k1, (N, C, H2, W2), jnp.float32)
    out2 = jax.block_until_ready(encoder_block(x2, w, b, p_tile=128))
    ref2 = jax.block_until_ready(encoder_block_ref(x2, w, b))
    assert out2.shape == (N, Co, H2 // 2, W2 // 2), out2.shape
    assert jnp.allclose(out2, ref2, atol=ATOL, rtol=RTOL), float(jnp.max(jnp.abs(out2 - ref2)))

    print("KERNEL_OK")
</pallas_src>

<mosaic_0001>
module attributes {stable_mosaic.version = 11 : i64} {
  func.func @_fused_kernel(%arg0: i32, %arg1: memref<8x36xbf16, #tpu.memory_space<vmem>>, %arg2: memref<1x36x64xbf16, #tpu.memory_space<vmem>>, %arg3: memref<1x8x64xf32, #tpu.memory_space<vmem>>) attributes {dimension_semantics = [#tpu.dimension_semantics<parallel>], iteration_bounds = array<i64: 2>, scalar_prefetch = 0 : i64, scratch_operands = 0 : i64, tpu.core_type = #tpu.core_type<tc>, window_params = [{pipeline_mode = #tpu.pipeline_mode<synchronous>, transform_indices = @transform_0, window_bounds = array<i64: 8, 36>}, {transform_indices = @transform_1, window_bounds = array<i64: 1, 36, 64>}, {transform_indices = @transform_2, window_bounds = array<i64: 1, 8, 64>}]} {
    %c0 = arith.constant 0 : index
    %c0_0 = arith.constant 0 : index
    %0 = vector.load %arg1[%c0, %c0_0] : memref<8x36xbf16, #tpu.memory_space<vmem>>, vector<8x36xbf16>
    %c0_1 = arith.constant 0 : index
    %c0_2 = arith.constant 0 : index
    %c0_3 = arith.constant 0 : index
    %1 = vector.load %arg2[%c0_1, %c0_2, %c0_3] : memref<1x36x64xbf16, #tpu.memory_space<vmem>>, vector<1x36x64xbf16>
    %2 = vector.shape_cast %1 : vector<1x36x64xbf16> to vector<36x64xbf16>
    %cst = arith.constant dense<0.000000e+00> : vector<8x64xf32>
    %3 = tpu.matmul %0, %2, %cst {dimension_numbers = #tpu.dot_dimension_numbers<[1], [0], [0], [1], [0, 0, 1, 1], [], []>} : vector<8x36xbf16>, vector<36x64xbf16>, vector<8x64xf32> -> vector<8x64xf32>
    %cst_4 = arith.constant dense<0.000000e+00> : vector<8xf32>
    %4 = vector.multi_reduction <add>, %3, %cst_4 [1] : vector<8x64xf32> to vector<8xf32>
    %5 = vector.shape_cast %4 : vector<8xf32> to vector<8x1xf32>
    %cst_5 = arith.constant 1.562500e-02 : f32
    %6 = vector.broadcast %cst_5 : f32 to vector<8x1xf32>
    %7 = arith.mulf %5, %6 : vector<8x1xf32>
    %8 = vector.broadcast %7 : vector<8x1xf32> to vector<8x64xf32>
    %9 = arith.subf %3, %8 : vector<8x64xf32>
    %10 = arith.mulf %9, %9 : vector<8x64xf32>
    %cst_6 = arith.constant dense<0.000000e+00> : vector<8xf32>
    %11 = vector.multi_reduction <add>, %10, %cst_6 [1] : vector<8x64xf32> to vector<8xf32>
    %12 = vector.shape_cast %11 : vector<8xf32> to vector<8x1xf32>
    %cst_7 = arith.constant 1.562500e-02 : f32
    %13 = vector.broadcast %cst_7 : f32 to vector<8x1xf32>
    %14 = arith.mulf %12, %13 : vector<8x1xf32>
    %cst_8 = arith.constant 9.99999974E-6 : f32
    %15 = vector.broadcast %cst_8 : f32 to vector<8x1xf32>
    %16 = arith.addf %14, %15 : vector<8x1xf32>
    %17 = math.rsqrt %16 : vector<8x1xf32>
    %18 = vector.broadcast %17 : vector<8x1xf32> to vector<8x64xf32>
    %19 = arith.mulf %9, %18 : vector<8x64xf32>
    %cst_9 = arith.constant 0.000000e+00 : f32
    %20 = vector.broadcast %cst_9 : f32 to vector<8x64xf32>
    %21 = arith.maximumf %19, %20 : vector<8x64xf32>
    %c0_10 = arith.constant 0 : index
    %c0_11 = arith.constant 0 : index
    %c0_12 = arith.constant 0 : index
    %22 = vector.load %arg3[%c0_10, %c0_11, %c0_12] : memref<1x8x64xf32, #tpu.memory_space<vmem>>, vector<1x8x64xf32>
    %23 = vector.shape_cast %22 : vector<1x8x64xf32> to vector<8x64xf32>
    %24 = vector.shape_cast %21 : vector<8x64xf32> to vector<1x8x64xf32>
    tpu.vector_store %arg3[%c0_10, %c0_11, %c0_12], %24 {strides = array<i32>} : memref<1x8x64xf32, #tpu.memory_space<vmem>>, vector<1x8x64xf32>,
    return
  }
  func.func @transform_0(%arg0: i32) -> (i32, i32) {
    %c0_i32 = arith.constant 0 : i32
    %c0_i32_0 = arith.constant 0 : i32
    %c0_i32_1 = arith.constant 0 : i32
    return %c0_i32, %c0_i32_0 : i32, i32
  }
  func.func @transform_1(%arg0: i32) -> (i32, i32, i32) {
    %c0_i32 = arith.constant 0 : i32
    %c0_i32_0 = arith.constant 0 : i32
    %c0_i32_1 = arith.constant 0 : i32
    return %arg0, %c0_i32, %c0_i32_0 : i32, i32, i32
  }
  func.func @transform_2(%arg0: i32) -> (i32, i32, i32) {
    %c0_i32 = arith.constant 0 : i32
    %c0_i32_0 = arith.constant 0 : i32
    %c0_i32_1 = arith.constant 0 : i32
    return %arg0, %c0_i32, %c0_i32_0 : i32, i32, i32
  }
}

</mosaic_0001>

<bundles_post_ra>
// kernel: tpu_custom_call.1
= control target key start
LH: loop header
LB: loop body
LE: loop exit
PB: predicated region body
PF: predicated region fallthrough
CT: control target
= control target key end

     0   :  { %7 = vsyncpa [#allocation3], 0  ;;  %s518_s0 = inlined_call_operand.vmem [shape: bf16[8,36], index: 0, kind: input, shape index: {}]   ;;  %s519_s1 = inlined_call_operand.vmem [shape: bf16[2,36,64], index: 1, kind: input, shape index: {}]   ;;  %s520_s2 = inlined_call_operand.hbm [shape: f32[2,8,64], index: 2, kind: output, shape index: {}]  }
   0x1   :  { %9 = vsyncpa [#allocation3 + $0x1], 0  ;;  %s427_s9 = smov 0   ;;  %s429_s10 = smov 0  }
   0x2   :  { %s431_s11 = smov 0   ;;  %s433_s12 = smov 0  }
   0x3 LB: > { %s448_s13 = sadd.s32 4294967295, %s410_s12   ;;  %s285_s14 = sadd.s32 4294967294, %s410_s12   ;;  %s410_s12 = sphi %s433_s12, %s526_s12   ;;  %s406_s11 = sphi %s431_s11, %s525_s11   ;;  %s402_s10 = sphi %s429_s10, %s524_s10   ;;  %s398_s9 = sphi %s427_s9, %s523_s9  }
   0x4   : > { %s452_s15 = sadd.s32 1, %s410_s12   ;;  %s69_s16 = sadd.s32 1, %s406_s11 }
   0x5   : > { %s66_s17 = ssub.s32 %s410_s12, %s452_s15  ;;  %p79_p0 = scmp.ne.s32.totalorder %s406_s11, %s402_s10 }
   0x6   : > { %p67_p1 = scmp.eq.s32.totalorder %s66_s17, 0  ;;  %p80_p2 = scmp.eq.s32.totalorder %s448_s13, 1 }
   0x7   : > { %p85_p3 = scmp.ne.s32.totalorder %s402_s10, %s398_s9  ;;  %p86_p4 = scmp.eq.s32.totalorder %s285_s14, 1 }
   0x8   : > { %s463_s18 = scalar_select %p67_p1, %s406_s11, %s69_s16  }
   0x9   : > { %p465_p5 = por %p80_p2, %p79_p0  ;;  %p469_p6 = por %p86_p4, %p85_p3 }
   0xa   : > { %p288_p7 = scmp.ge.s32.totalorder %s410_s12, 1  ;;  %p115_p8 = scmp.lt.s32.totalorder %s410_s12, 3 }
   0xc   : > { %p116_p9 = pnand %p288_p7, %p115_p8 }
   0xd   : > { %p137_p10 = scmp.lt.s32.totalorder (!%p116_p9), %s448_s13, 1  ;;  %s134_s28 = sand.u32 (!%p116_p9), 1, %s402_s10  }
   0xe   : > { %119 = sbr.rel (%p116_p9) target bundleno = 436 (0x1b4), region = 28  ;;  %s289_s29 = sshll.u32 (!%p116_p9), %s134_s28, 3 }
   0xf   : > { %s301_s30 = sshll.u32 (!%p116_p9), %s448_s13, 3  ;;  %s136_s6 = scalar_lea.vmem (!%p116_p9), [#allocation2], %s289_s29 }
  0x10   : > { %s221_s5 = scalar_lea.hbm (!%p116_p9), %s520_s2, %s301_s30  ;;  %s223_s7 = sshll.u32 (!%p116_p9), %s136_s6, 4  ;;  %s224_s7 = int_to_ptr.vmem [resolvable:$true] %s223_s7 }
  0x11   : > { %s225_s8 = sshll.u32 (!%p116_p9), %s221_s5, 4  ;;  %s226_s8 = int_to_ptr.hbm [resolvable:$true] %s225_s8 }
  0x12   : > { %s362_s14 = sshra.s32 (!%p116_p9), %s226_s8, 4  ;;  %s363_s14 = int_to_ptr.hbm [resolvable:$true] %s362_s14 }
  0x13   : > { %s138_s21 = scalar_select %p137_p10, %s448_s13, 1  ;;  %vm168_vm0 = vcmask 1041408   ;;  %v143_v6 = vld [vmem:[%s518_s0] sm:$0xf]  ;;  %vm164_vm1 = vcmask 293888   ;;  %vm185_vm2 = vcmask 523264  }
  0x14   : > { %s211_s13 = scalar_lea.sflag [#allocation3], %s134_s28  ;;  %s364_s16 = scalar_lea.hbm %s363_s14, 8 }
  0x15   : > { %s306_s22 = smul.u32 20, %s138_s21  ;;  %p365_p11 = scmp.ne.s32.totalorder %s363_s14, %s364_s16 }
  0x16   : > { %p369_p0 = scmp.lt.s32.totalorder %s363_s14, %s520_s2 }
  0x17   : > { %s141_s25 = scalar_lea.vmem %s519_s1, %s306_s22  ;;  %p366_p12 = pnand %p365_p11, %p465_p5 }
  0x18   : > { %v148_v0 = vld [vmem:[%s141_s25 + $0x10] sm:$0x3]  ;;  %v305_v4 = vld [vmem:[%s141_s25 + $0x8] sm:$0xff]  ;;  %v304_v5 = vld [vmem:[%s141_s25] sm:$0xff]  ;;  %s368_s22 = scalar_lea.hbm %s520_s2, 16 }
  0x19   : > { %v158_v1 = vunpack.c.l.b16 %v148_v0  ;;  %p367_p13 = pneg %p366_p12  ;;  %p370_p1 = scmp.lt.s32.totalorder %s368_s22, %s364_s16 }
  0x1b   : > { %v161_v2 = vpack.c.b16 %v158_v1, %v158_v1  ;;  %p371_p2 = por %p370_p1, %p369_p0 }
  0x1d   : > { %v170_v3 = vsel %vm168_vm0, %v161_v2, 0  ;;  %p372_p3 = pnand %p371_p2, %p367_p13 }
  0x1e   : > { %177 = vmatpush.bf16.msra.mxu0 %v170_v3 }
  0x22   : > { %178 = vmatpush.bf16.msra.mxu0 %v305_v4 }
  0x26   : > { %179 = vmatpush.bf16.msra.mxu0 %v304_v5 }
  0x29   : > { %299 = vmatmul.msk.bf16.vlgmr.msra.gmra.mxu0 %vm164_vm1, %v143_v6 }
  0xa6   : > { %v181_v7 = vpop.f32.mrf.mxu0 }
  0xa7   : > { %v186_v8 = vsel %vm185_vm2, %v181_v7, 0.0 }
  0xa8   : > { %187 = vadd.xlane.f32.xlu0 %v186_v8 }
  0xae   : > { %v183_v9 = vpop.f32.mrf.mxu0 }
 0x11b   : > { %v188_v10 = vpop.xlane.xlu0 %187 }
 0x11c   : > { %v189_v11 = vmul.f32 0.015625, %v188_v10 }
 0x11e   : > { %v190_v12 = vsub.f32 %v181_v7, %v189_v11 }
 0x120   : > { %v191_v13 = vmul.f32 %v190_v12, %v190_v12 }
 0x122   : > { %v192_v14 = vsel %vm185_vm2, %v191_v13, 0.0 }
 0x123   : > { %193 = vadd.xlane.f32.xlu0 %v192_v14 }
 0x196   : > { %v194_v15 = vpop.xlane.xlu0 %193 }
 0x197   : > { %v195_v16 = vmul.f32 0.015625, %v194_v15 }
 0x199   : > { %v196_v17 = vadd.f32 1e-05, %v195_v16 }
 0x19b   : > { %346 = vrsqrt.f32 %v196_v17  ;;  %vm203_vm4 = vweird.f32 %v196_v17 }
 0x1a1   : > { %v347_v18 = vpop.eup %346 }
 0x1a2   : > { %v198_v19 = vmul.f32 %v347_v18, %v196_v17  ;;  %vm204_vm3 = vweird.f32 %v347_v18 }
 0x1a3   : > { %vm205_vm5 = vmor %vm203_vm4, %vm204_vm3 }
 0x1a4   : > { %v199_v20 = vmul.f32 %v347_v18, %v198_v19 }
 0x1a6   : > { %v200_v21 = vmul.f32 0.5, %v199_v20 }
 0x1a8   : > { %v201_v22 = vsub.f32 1.5, %v200_v21 }
 0x1aa   : > { %v202_v23 = vmul.f32 %v347_v18, %v201_v22 }
 0x1ac   : > { %v206_v24 = vsel %vm205_vm5, %v347_v18, %v202_v23 }
 0x1ad   : > { %v207_v25 = vmul.f32 %v206_v24, %v190_v12 }
 0x1af   : > { %v208_v26 = vmax.f32 %v207_v25, 0.0 }
 0x1b1   : > { %209 = vst.msk [vmem:[%s136_s6] sm:$0xff] %vm185_vm2, %v208_v26 }
 0x1b2   : > { %375 = shalt.err (!%p372_p3)
}
 0x1b3   : > { %307 = dma.vmem_to_hbm [thread:$0]  (%p465_p5), %s224_s7, 128, %s226_s8, %s211_s13  }
 0x1b4 PF: > { %p313_p4 = scmp.ge.s32.totalorder %s410_s12, 2  ;;  %s237_s25 = sand.u32 1, %s398_s9  }
 0x1b5   : > { %s238_s26 = scalar_lea.sflag [#allocation3], %s237_s25 }
 0x1b6   : > { %p310_p7 = pnand %p313_p4, %p469_p6 }
 0x1b8   : > { %p311_p8 = pneg %p310_p7 }
 0x1ba   : > { %393 = dma.done.wait (%p311_p8), %s238_s26, 128  }
 0x1bb   : > { %395 = vsyncadd (%p311_p8), %s238_s26, 4294967168  ;;  %p12_p9 = scmp.ge.s32.totalorder %s452_s15, 4   ;;  %s523_s9 = smov %s402_s10 }
 0x1bc   : > { %s524_s10 = smov %s406_s11  ;;  %s525_s11 = smov %s463_s18 }
 0x1bd   : > { %s526_s12 = smov %s452_s15  ;;  %14 = sbr.rel (!%p12_p9) target bundleno = 3 (0x3), region = 63 }
 0x1c2   :  { %244 = vsyncpa [#allocation3], 1 }
 0x1c3   :  { %246 = vsyncpa [#allocation3 + $0x1], 1 }

</bundles_post_ra>
